<compile_context>
chip_gen: v7x
topology: tpu7x:2x2x1
jax: 0.10.0
libtpu: 0.0.40
codegen_flags: <defaults>
</compile_context>

<pallas_src>
import jax
import jax.numpy as jnp
from jax.experimental import pallas as pl
from jax.experimental.pallas import tpu as pltpu


def _round_up(x, m):
    return ((x + m - 1) // m) * m


def _make_ce_prob_kernel(c, tile_n, hw, ignore_label):
    def kernel(tgt_ref, x_ref, nll_ref, prob_ref, valid_ref):
        j = pl.program_id(1)
        col = jax.lax.broadcasted_iota(jnp.int32, (1, tile_n), 1) + j * tile_n
        in_range = col < hw                                      # (1, TN) ragged-tail mask
        t = tgt_ref[0]                                           # (1, TN) int32
        valid = jnp.logical_and(in_range, t != ignore_label)
        t0 = jnp.where(valid, t, 0)                              # target * valid_mask
        x = x_ref[0].astype(jnp.float32)                         # (C, TN) logits
        x = jnp.where(in_range, x, 0.0)                          # neutralize OOB-tail garbage
        m = jnp.max(x, axis=0, keepdims=True)                    # (1, TN)
        lse = m + jnp.log(jnp.sum(jnp.exp(x - m), axis=0, keepdims=True))
        cls = jax.lax.broadcasted_iota(jnp.int32, (c, tile_n), 0)
        logit_t = jnp.sum(jnp.where(cls == t0, x, 0.0), axis=0, keepdims=True)
        nll = lse - logit_t                                      # -log softmax(target)
        prob_t = jnp.exp(logit_t - lse)                          # softmax prob of target
        nll_ref[0] = jnp.where(valid, nll, 0.0)
        prob_ref[0] = jnp.where(valid, prob_t, 1.0)              # masked_fill(~valid, 1.0)
        valid_ref[0] = valid.astype(jnp.float32)
    return kernel


def _make_ohem_reduce_kernel(r_total, r_block, nblocks, steps, acc_r):
    def kernel(scal_ref, nll_ref, prob_ref, valid_ref, sum_ref, cnt_ref):
        s = pl.program_id(0)
        t = pl.program_id(1)

        @pl.when(t == 0)
        def _init():
            sum_ref[...] = jnp.zeros_like(sum_ref)
            cnt_ref[...] = jnp.zeros_like(cnt_ref)

        g = s * steps + t                                        # global block id (may overrun)

        @pl.when(g < nblocks)
        def _accum():
            thr = scal_ref[0]                                    # SMEM scalars
            no_ohem = scal_ref[1] < 0.5
            row = jax.lax.broadcasted_iota(jnp.int32, (r_block, 1), 0) + g * r_block
            in_rows = row < r_total                              # ragged-tail row mask
            valid = valid_ref[...] > 0.5
            kept = jnp.logical_and(valid,
                                   jnp.logical_or(prob_ref[...] <= thr, no_ohem))
            kept = jnp.logical_and(kept, in_rows)
            loss_part = jnp.where(kept, nll_ref[...], 0.0)       # where(): NaN-safe vs tail garbage
            cnt_part = kept.astype(jnp.float32)

            def fold(x):                                         # (r_block, 128) -> (acc_r, 128)
                if acc_r == 8:
                    return jnp.sum(x.reshape(-1, 8, 128), axis=0)   # pure VPU vreg adds
                return jnp.sum(x, axis=0, keepdims=True)            # tiny-input fallback

            sum_ref[...] += fold(loss_part)
            cnt_ref[...] += fold(cnt_part)
    return kernel


def prob_ohem_cross_entropy_2d(pred, target, *, ignore_label, thresh=0.6, min_kept=256,
                               tile_n=8192, reduce_rows=2048):
    b, c, h, w = pred.shape
    hw = h * w
    n = b * hw

    logits = pred.reshape(b, c, hw)                  # NCHW is already channel-major: no transpose
    tgt = target.reshape(b, 1, hw).astype(jnp.int32)

    # ----- kernel 1: per-pixel NLL / prob / valid (classes on sublanes, pixels on lanes) -----
    tile_n = min(int(tile_n), _round_up(hw, 128))
    cap = max(512, ((1 << 20) // max(c, 1)) // 128 * 128)   # keep double-buffered logits block <= ~8 MiB
    tile_n = min(tile_n, cap)
    tile_n = max(128, (tile_n // 128) * 128)
    nt = pl.cdiv(hw, tile_n)
    hw_pad = nt * tile_n

    pix_spec = pl.BlockSpec((1, 1, tile_n), lambda bi, j: (bi, 0, j))
    nll, prob_m, valid = pl.pallas_call(
        _make_ce_prob_kernel(c, tile_n, hw, int(ignore_label)),
        out_shape=tuple(jax.ShapeDtypeStruct((b, 1, hw_pad), jnp.float32) for _ in range(3)),
        grid=(b, nt),
        in_specs=[pix_spec,
                  pl.BlockSpec((1, c, tile_n), lambda bi, j: (bi, 0, j))],
        out_specs=(pix_spec, pix_spec, pix_spec),
        compiler_params=pltpu.CompilerParams(
            dimension_semantics=("parallel", "parallel")),
    )(tgt, logits)

    # ----- threshold selection (plain-JAX glue) -----
    num_valid = jnp.sum(target.reshape(-1).astype(jnp.int32) != jnp.int32(ignore_label))
    min_kept = int(min_kept)
    if min_kept > 0:
        k = min(n, min_kept)
        # TODO(synk): k-th-smallest selection has no clean Pallas TPU primitive; lax.top_k glue
        #             (padded entries are 1.0, the max possible prob, so the k-th value is unchanged).
        kth = -jax.lax.top_k(-prob_m.reshape(-1), k)[0][k - 1]
        threshold = jnp.maximum(kth, jnp.asarray(thresh, jnp.float32))
        # PyTorch applies OHEM only when num_valid > 0 and not (min_kept > num_valid).
        apply_ohem = jnp.logical_and(num_valid > 0, num_valid >= min_kept)
    else:
        threshold = jnp.asarray(thresh, jnp.float32)
        apply_ohem = jnp.zeros((), dtype=jnp.bool_)
    scal = jnp.stack([threshold.astype(jnp.float32), apply_ohem.astype(jnp.float32)])

    # ----- kernel 2: masked mean reduction over a lane-dense (r_total, 128) view -----
    total = b * hw_pad                    # multiple of 128 by construction
    r_total = total // 128
    nll2 = nll.reshape(r_total, 128)
    prob2 = prob_m.reshape(r_total, 128)
    valid2 = valid.reshape(r_total, 128)

    r_block = min(int(reduce_rows), r_total)
    if r_block < r_total:
        r_block = max(8, (r_block // 8) * 8)
    nblocks = pl.cdiv(r_total, r_block)
    splits = 2 if nblocks >= 2 else 1     # shard the reduction across 2 TCs (v7x megacore)
    steps = pl.cdiv(nblocks, splits)
    acc_r = 8 if r_block % 8 == 0 else 1  # (8,128) vector accumulator; tiny-input fallback is (1,128)

    def in_map(s, t):
        # clamp so no block index is fully out of range; kernel skips duplicate (overrun) steps
        return (jnp.minimum(s * steps + t, nblocks - 1), 0)

    red_spec = pl.BlockSpec((r_block, 128), in_map)
    sums, cnts = pl.pallas_call(
        _make_ohem_reduce_kernel(r_total, r_block, nblocks, steps, acc_r),
        out_shape=(jax.ShapeDtypeStruct((splits * acc_r, 128), jnp.float32),
                   jax.ShapeDtypeStruct((splits * acc_r, 128), jnp.float32)),
        grid=(splits, steps),
        in_specs=[pl.BlockSpec(memory_space=pltpu.MemorySpace.SMEM),   # [threshold, apply_ohem]
                  red_spec, red_spec, red_spec],
        out_specs=(pl.BlockSpec((acc_r, 128), lambda s, t: (s, 0)),
                   pl.BlockSpec((acc_r, 128), lambda s, t: (s, 0))),
        compiler_params=pltpu.CompilerParams(
            dimension_semantics=("parallel", "arbitrary")),
    )(scal, nll2, prob2, valid2)

    # CrossEntropyLoss(reduction='mean', ignore_index=...): NaN if nothing kept (matches PyTorch).
    return jnp.sum(sums) / jnp.sum(cnts)


def reference_loss(pred, target, *, ignore_label, thresh, min_kept):
    """Pure-JAX reimplementation of the PyTorch forward, for checking."""
    b, c, h, w = pred.shape
    n = b * h * w
    t = target.reshape(n).astype(jnp.int32)
    valid = t != ignore_label
    t0 = jnp.where(valid, t, 0)
    logits = jnp.transpose(pred, (0, 2, 3, 1)).reshape(n, c).astype(jnp.float32)
    logp = jax.nn.log_softmax(logits, axis=-1)
    rows = jnp.arange(n)
    nll = -logp[rows, t0]
    prob_t = jnp.exp(logp[rows, t0])
    mask_prob = jnp.where(valid, prob_t, 1.0)
    num_valid = jnp.sum(valid)
    k = min(n, int(min_kept))
    kth = jnp.sort(mask_prob)[k - 1]
    threshold = jnp.where(kth > thresh, kth, jnp.float32(thresh))
    apply = (num_valid > 0) & (num_valid >= min_kept)
    kept = jnp.where(apply, valid & (mask_prob <= threshold), valid)
    kf = kept.astype(jnp.float32)
    return jnp.sum(nll * kf) / jnp.sum(kf)


if __name__ == "__main__":
    key = jax.random.PRNGKey(0)
    k1, k2, k3 = jax.random.split(key, 3)
    b, c, h, w = 2, 4, 16, 16
    ignore_label = 255
    thresh = 0.6
    min_kept = 256

    pred = jax.random.normal(k1, (b, c, h, w), dtype=jnp.float32)
    target = jax.random.randint(k2, (b, h, w), 0, c, dtype=jnp.int32)
    ignore_mask = jax.random.uniform(k3, (b, h, w)) < 0.1
    target = jnp.where(ignore_mask, jnp.int32(ignore_label), target)

    loss = prob_ohem_cross_entropy_2d(pred, target, ignore_label=ignore_label,
                                      thresh=thresh, min_kept=min_kept)
    loss = jax.block_until_ready(loss)

    ref = reference_loss(pred, target, ignore_label=ignore_label,
                         thresh=thresh, min_kept=min_kept)
    assert jnp.allclose(loss, ref, rtol=1e-3, atol=1e-3), (float(loss), float(ref))
    print("KERNEL_OK")
</pallas_src>

<mosaic_0001>
module attributes {stable_mosaic.version = 11 : i64} {
  func.func @kernel(%arg0: i32, %arg1: i32, %arg2: memref<1x1x256xi32, #tpu.memory_space<vmem>>, %arg3: memref<1x4x256xf32, #tpu.memory_space<vmem>>, %arg4: memref<1x1x256xf32, #tpu.memory_space<vmem>>, %arg5: memref<1x1x256xf32, #tpu.memory_space<vmem>>, %arg6: memref<1x1x256xf32, #tpu.memory_space<vmem>>) attributes {dimension_semantics = [#tpu.dimension_semantics<parallel>, #tpu.dimension_semantics<parallel>], iteration_bounds = array<i64: 2, 1>, scalar_prefetch = 0 : i64, scratch_operands = 0 : i64, tpu.core_type = #tpu.core_type<tc>, window_params = [{transform_indices = @transform_0, window_bounds = array<i64: 1, 1, 256>}, {transform_indices = @transform_1, window_bounds = array<i64: 1, 4, 256>}, {transform_indices = @transform_2, window_bounds = array<i64: 1, 1, 256>}, {transform_indices = @transform_3, window_bounds = array<i64: 1, 1, 256>}, {transform_indices = @transform_4, window_bounds = array<i64: 1, 1, 256>}]} {
    %0 = tpu.iota {dimensions = array<i32: 1>} : vector<1x256xi32>
    %c256_i32 = arith.constant 256 : i32
    %1 = arith.muli %arg1, %c256_i32 : i32
    %2 = vector.broadcast %1 : i32 to vector<1x256xi32>
    %3 = arith.addi %0, %2 : vector<1x256xi32>
    %c256_i32_0 = arith.constant 256 : i32
    %4 = vector.broadcast %c256_i32_0 : i32 to vector<1x256xi32>
    %5 = arith.cmpi slt, %3, %4 : vector<1x256xi32>
    %c0 = arith.constant 0 : index
    %c0_1 = arith.constant 0 : index
    %c0_2 = arith.constant 0 : index
    %6 = vector.load %arg2[%c0, %c0_1, %c0_2] : memref<1x1x256xi32, #tpu.memory_space<vmem>>, vector<1x1x256xi32>
    %7 = vector.shape_cast %6 : vector<1x1x256xi32> to vector<1x256xi32>
    %c255_i32 = arith.constant 255 : i32
    %8 = vector.broadcast %c255_i32 : i32 to vector<1x256xi32>
    %9 = arith.cmpi ne, %7, %8 : vector<1x256xi32>
    %10 = arith.andi %5, %9 : vector<1x256xi1>
    %c0_i32 = arith.constant 0 : i32
    %11 = vector.broadcast %c0_i32 : i32 to vector<1x256xi32>
    %12 = arith.select %10, %7, %11 : vector<1x256xi1>, vector<1x256xi32>
    %c0_3 = arith.constant 0 : index
    %c0_4 = arith.constant 0 : index
    %c0_5 = arith.constant 0 : index
    %13 = vector.load %arg3[%c0_3, %c0_4, %c0_5] : memref<1x4x256xf32, #tpu.memory_space<vmem>>, vector<1x4x256xf32>
    %14 = vector.shape_cast %13 : vector<1x4x256xf32> to vector<4x256xf32>
    %cst = arith.constant 0.000000e+00 : f32
    %15 = vector.shape_cast %5 : vector<1x256xi1> to vector<1x256xi1>
    %16 = vector.broadcast %15 : vector<1x256xi1> to vector<4x256xi1>
    %17 = vector.broadcast %cst : f32 to vector<4x256xf32>
    %18 = arith.select %16, %14, %17 : vector<4x256xi1>, vector<4x256xf32>
    %cst_6 = arith.constant dense<0xFF800000> : vector<256xf32>
    %19 = vector.multi_reduction <maximumf>, %18, %cst_6 [0] : vector<4x256xf32> to vector<256xf32>
    %20 = vector.shape_cast %19 : vector<256xf32> to vector<1x256xf32>
    %21 = vector.broadcast %20 : vector<1x256xf32> to vector<4x256xf32>
    %22 = arith.subf %18, %21 : vector<4x256xf32>
    %23 = math.exp %22 : vector<4x256xf32>
    %cst_7 = arith.constant dense<0.000000e+00> : vector<256xf32>
    %24 = vector.multi_reduction <add>, %23, %cst_7 [0] : vector<4x256xf32> to vector<256xf32>
    %25 = vector.shape_cast %24 : vector<256xf32> to vector<1x256xf32>
    %26 = math.log %25 : vector<1x256xf32>
    %27 = arith.addf %20, %26 : vector<1x256xf32>
    %28 = tpu.iota {dimensions = array<i32: 0>} : vector<4x256xi32>
    %29 = vector.broadcast %12 : vector<1x256xi32> to vector<4x256xi32>
    %30 = arith.cmpi eq, %28, %29 : vector<4x256xi32>
    %cst_8 = arith.constant 0.000000e+00 : f32
    %31 = vector.broadcast %cst_8 : f32 to vector<4x256xf32>
    %32 = arith.select %30, %18, %31 : vector<4x256xi1>, vector<4x256xf32>
    %cst_9 = arith.constant dense<0.000000e+00> : vector<256xf32>
    %33 = vector.multi_reduction <add>, %32, %cst_9 [0] : vector<4x256xf32> to vector<256xf32>
    %34 = vector.shape_cast %33 : vector<256xf32> to vector<1x256xf32>
    %35 = arith.subf %27, %34 : vector<1x256xf32>
    %36 = arith.subf %34, %27 : vector<1x256xf32>
    %37 = math.exp %36 : vector<1x256xf32>
    %cst_10 = arith.constant 0.000000e+00 : f32
    %38 = vector.broadcast %cst_10 : f32 to vector<1x256xf32>
    %39 = arith.select %10, %35, %38 : vector<1x256xi1>, vector<1x256xf32>
    %c0_11 = arith.constant 0 : index
    %c0_12 = arith.constant 0 : index
    %c0_13 = arith.constant 0 : index
    %40 = vector.load %arg4[%c0_11, %c0_12, %c0_13] : memref<1x1x256xf32, #tpu.memory_space<vmem>>, vector<1x1x256xf32>
    %41 = vector.shape_cast %40 : vector<1x1x256xf32> to vector<1x256xf32>
    %42 = vector.shape_cast %39 : vector<1x256xf32> to vector<1x1x256xf32>
    tpu.vector_store %arg4[%c0_11, %c0_12, %c0_13], %42 {strides = array<i32>} : memref<1x1x256xf32, #tpu.memory_space<vmem>>, vector<1x1x256xf32>,
    %cst_14 = arith.constant 1.000000e+00 : f32
    %43 = vector.broadcast %cst_14 : f32 to vector<1x256xf32>
    %44 = arith.select %10, %37, %43 : vector<1x256xi1>, vector<1x256xf32>
    %c0_15 = arith.constant 0 : index
    %c0_16 = arith.constant 0 : index
    %c0_17 = arith.constant 0 : index
    %45 = vector.load %arg5[%c0_15, %c0_16, %c0_17] : memref<1x1x256xf32, #tpu.memory_space<vmem>>, vector<1x1x256xf32>
    %46 = vector.shape_cast %45 : vector<1x1x256xf32> to vector<1x256xf32>
    %47 = vector.shape_cast %44 : vector<1x256xf32> to vector<1x1x256xf32>
    tpu.vector_store %arg5[%c0_15, %c0_16, %c0_17], %47 {strides = array<i32>} : memref<1x1x256xf32, #tpu.memory_space<vmem>>, vector<1x1x256xf32>,
    %48 = arith.extui %10 : vector<1x256xi1> to vector<1x256xi32>
    %49 = arith.sitofp %48 : vector<1x256xi32> to vector<1x256xf32>
    %c0_18 = arith.constant 0 : index
    %c0_19 = arith.constant 0 : index
    %c0_20 = arith.constant 0 : index
    %50 = vector.load %arg6[%c0_18, %c0_19, %c0_20] : memref<1x1x256xf32, #tpu.memory_space<vmem>>, vector<1x1x256xf32>
    %51 = vector.shape_cast %50 : vector<1x1x256xf32> to vector<1x256xf32>
    %52 = vector.shape_cast %49 : vector<1x256xf32> to vector<1x1x256xf32>
    tpu.vector_store %arg6[%c0_18, %c0_19, %c0_20], %52 {strides = array<i32>} : memref<1x1x256xf32, #tpu.memory_space<vmem>>, vector<1x1x256xf32>,
    return
  }
  func.func @transform_0(%arg0: i32, %arg1: i32) -> (i32, i32, i32) {
    %c0_i32 = arith.constant 0 : i32
    %c0_i32_0 = arith.constant 0 : i32
    return %arg0, %c0_i32, %arg1 : i32, i32, i32
  }
  func.func @transform_1(%arg0: i32, %arg1: i32) -> (i32, i32, i32) {
    %c0_i32 = arith.constant 0 : i32
    %c0_i32_0 = arith.constant 0 : i32
    return %arg0, %c0_i32, %arg1 : i32, i32, i32
  }
  func.func @transform_2(%arg0: i32, %arg1: i32) -> (i32, i32, i32) {
    %c0_i32 = arith.constant 0 : i32
    %c0_i32_0 = arith.constant 0 : i32
    return %arg0, %c0_i32, %arg1 : i32, i32, i32
  }
  func.func @transform_3(%arg0: i32, %arg1: i32) -> (i32, i32, i32) {
    %c0_i32 = arith.constant 0 : i32
    %c0_i32_0 = arith.constant 0 : i32
    return %arg0, %c0_i32, %arg1 : i32, i32, i32
  }
  func.func @transform_4(%arg0: i32, %arg1: i32) -> (i32, i32, i32) {
    %c0_i32 = arith.constant 0 : i32
    %c0_i32_0 = arith.constant 0 : i32
    return %arg0, %c0_i32, %arg1 : i32, i32, i32
  }
}

</mosaic_0001>

<bundles_post_ra>
// kernel: tpu_custom_call.1
= control target key start
LH: loop header
LB: loop body
LE: loop exit
PB: predicated region body
PF: predicated region fallthrough
CT: control target
= control target key end

     0   :  { %10 = vsyncpa [#allocation3], 0  ;;  %s1441_s0 = inlined_call_operand.hbm [shape: s32[2,1,256], index: 0, kind: input, shape index: {}]   ;;  %s1442_s1 = inlined_call_operand.hbm [shape: f32[2,4,256], index: 1, kind: input, shape index: {}]   ;;  %s1443_s2 = inlined_call_operand.hbm [shape: f32[2,1,256], index: 2, kind: output, shape index: {0}]   ;;  %s1444_s3 = inlined_call_operand.hbm [shape: f32[2,1,256], index: 3, kind: output, shape index: {1}]   ;;  %s1445_s4 = inlined_call_operand.hbm [shape: f32[2,1,256], index: 4, kind: output, shape index: {2}]  }
   0x1   :  { %12 = vsyncpa [#allocation3 + $0x1], 0 }
   0x2   :  { %13 = vsyncpa [#allocation6], 0 }
   0x3   :  { %15 = vsyncpa [#allocation6 + $0x1], 0 }
   0x4   :  { %16 = vsyncpa [#allocation4], 0 }
   0x5   :  { %18 = vsyncpa [#allocation4 + $0x1], 0 }
   0x6   :  { %19 = vsyncpa [#allocation9], 0 }
   0x7   :  { %21 = vsyncpa [#allocation9 + $0x1], 0  ;;  %s1095_s15 = smov 0   ;;  %s1097_s16 = smov 0  }
   0x8   :  { %s1099_s17 = smov 0   ;;  %s1101_s18 = smov 0  }
   0x9   :  { %s1103_s19 = smov 0   ;;  %s1105_s20 = smov 0  }
   0xa LB: > { %s1126_s21 = sadd.s32 4294967295, %s1060_s20   ;;  %s1447_s22 = sadd.s32 4294967294, %s1060_s20   ;;  %s1060_s20 = sphi %s1105_s20, %s27_s20   ;;  %s1056_s19 = sphi %s1103_s19, %s1471_s19   ;;  %s1052_s18 = sphi %s1101_s18, %s1470_s18   ;;  %s1048_s17 = sphi %s1099_s17, %s1469_s17   ;;  %s1044_s16 = sphi %s1097_s16, %s1468_s16   ;;  %s1040_s15 = sphi %s1095_s15, %s1467_s15  }
   0xb   : > { %s39_s23 = sadd.s32 1, %s1056_s19  ;;  %s48_s24 = sadd.s32 1, %s1048_s17 }
   0xc   : > { %p41_p0 = scmp.ge.s32.totalorder %s39_s23, 2  ;;  %p55_p1 = scmp.ne.s32.totalorder %s1048_s17, %s1044_s16 }
   0xd   : > { %p56_p2 = scmp.eq.s32.totalorder %s1060_s20, 0  ;;  %p61_p3 = scmp.ne.s32.totalorder %s1044_s16, %s1040_s15 }
   0xe   : > { %s1473_s23 = smov (%p41_p0, %s39_s23), 0  ;;  %p62_p5 = scmp.eq.s32.totalorder %s1126_s21, 0 }
   0xf   : > { %p1138_p4 = por %p56_p2, %p55_p1  ;;  %s43_s26 = ssub.s32 %s1056_s19, %s1473_s23 }
  0x10   : > { %p115_p6 = scmp.eq.s32.totalorder %s1126_s21, 1  ;;  %p46_p7 = scmp.eq.s32.totalorder %s43_s26, 0 }
  0x11   : > { %p1146_p8 = por %p62_p5, %p61_p3  ;;  %p121_p10 = scmp.eq.s32.totalorder %s1447_s22, 1 }
  0x12   : > { %p1150_p9 = por %p115_p6, %p55_p1  ;;  %p788_p13 = scmp.lt.s32.totalorder %s1060_s20, 2 }
  0x13   : > { %s1450_s27 = scalar_select %p1146_p8, 1, 0 }
  0x14   : > { %s1451_s28 = scalar_select %p1150_p9, 1, 0 }
  0x15   : > { %s1157_s29 = scalar_select %p46_p7, %s1048_s17, %s48_s24  }
  0x16   : > { %p1159_p11 = por %p121_p10, %p61_p3  ;;  %s1166_s5 = sand.u32 1, %s1048_s17  }
  0x17   : > { %s731_s6 = sshll.u32 %s1166_s5, 1  ;;  %s756_s7 = sshll.u32 %s1056_s19, 5 }
  0x18   : > { %s1452_s30 = scalar_select %p1159_p11, 1, 0 }
  0x19   : > { %s1173_s10 = scalar_lea.hbm %s1441_s0, %s756_s7  ;;  %s201_s11 = scalar_lea.vmem [#allocation2], %s731_s6 }
  0x1a   : > { %s211_s12 = sshll.u32 %s201_s11, 4  ;;  %p1179_p0 = pnand %p788_p13, %p1138_p4  ;;  %s1175_s12 = int_to_ptr.vmem [resolvable:$true] %s211_s12 }
  0x1b   : > { %s198_s14 = scalar_lea.sflag [#allocation3], %s1166_s5  ;;  %s854_s24 = scalar_lea.hbm %s1173_s10, 32 }
  0x1c   : > { %p855_p3 = scmp.ne.s32.totalorder %s1173_s10, %s854_s24  ;;  %p856_p5 = pneg %p1179_p0 }
  0x1d   : > { %s859_s25 = scalar_lea.hbm %s1441_s0, 64  ;;  %p860_p4 = scmp.lt.u32.totalorder %s1173_s10, %s1441_s0 }
  0x1e   : > { %p857_p6 = pnand %p856_p5, %p855_p3  ;;  %p861_p10 = scmp.lt.u32.totalorder %s859_s25, %s854_s24 }
  0x1f   : > { %p863_p12 = scmp.lt.u32.totalorder %s854_s24, %s1173_s10 }
  0x20   : > { %p858_p7 = pneg %p857_p6  ;;  %p862_p13 = por %p861_p10, %p860_p4 }
  0x22   : > { %p864_p1 = por %p863_p12, %p862_p13 }
  0x24   : > { %p865_p2 = pnand %p864_p1, %p858_p7 }
  0x26   : > { %868 = shalt.err (!%p865_p2)
}
  0x27   : > { %s869_s9 = scalar_lea.vmem %s1175_s12, 32  ;;  %s1062_s11 = smov [#allocation2]  }
  0x28   : > { %p870_p3 = scmp.ne.s32.totalorder %s1175_s12, %s869_s9  ;;  %s874_s26 = sshll.u32 %s1062_s11, 4  ;;  %s875_s26 = int_to_ptr.vmem [resolvable:$false] %s874_s26 }
  0x29   : > { %s876_s6 = scalar_lea.vmem %s875_s26, 64  ;;  %p877_p9 = scmp.lt.s32.totalorder %s1175_s12, %s875_s26 }
  0x2a   : > { %p872_p6 = pnand %p870_p3, %p856_p5  ;;  %p878_p4 = scmp.lt.s32.totalorder %s876_s6, %s869_s9 }
  0x2c   : > { %p873_p11 = pneg %p872_p6  ;;  %p879_p10 = por %p878_p4, %p877_p9 }
  0x2e   : > { %p880_p12 = pnand %p879_p10, %p873_p11 }
  0x30   : > { %883 = shalt.err (!%p880_p12)
}
  0x31   : > { %774 = dma.hbm_to_vmem [thread:$0]  (!%p1179_p0), %s1173_s10, 32, %s1175_s12, %s198_s14  }
  0x32   : > { %p1454_p1 = scmp.lt.s32.totalorder %s1060_s20, 3  ;;  %p1455_p2 = scmp.ge.s32.totalorder %s1060_s20, 1 }
  0x33   : > { %s734_s25 = sshll.u32 %s1166_s5, 3  ;;  %s757_s7 = sshll.u32 %s1056_s19, 7 }
  0x34   : > { %p1215_p7 = pnand %p1455_p2, %p1454_p1  ;;  %s1224_s11 = scalar_lea.hbm %s1442_s1, %s757_s7 }
  0x35   : > { %s222_s26 = scalar_lea.vmem [#allocation5], %s734_s25  ;;  %s219_s10 = scalar_lea.sflag [#allocation6], %s1166_s5 }
  0x36   : > { %s1456_s24 = scalar_select %p1215_p7, 1, 0 }
  0x37   : > { %s232_s6 = sshll.u32 %s222_s26, 4  ;;  %s884_s12 = scalar_lea.hbm %s1224_s11, 128  ;;  %s233_s6 = int_to_ptr.vmem [resolvable:$true] %s232_s6 }
  0x38   : > { %p885_p9 = scmp.ne.s32.totalorder %s1224_s11, %s884_s12  ;;  %s889_s8 = scalar_lea.hbm %s1442_s1, 256 }
  0x39   : > { %p890_p3 = scmp.lt.u32.totalorder %s1224_s11, %s1442_s1  ;;  %p891_p6 = scmp.lt.u32.totalorder %s889_s8, %s884_s12 }
  0x3a   : > { %p887_p11 = pnand %p885_p9, %p856_p5  ;;  %p893_p10 = scmp.lt.u32.totalorder %s884_s12, %s1224_s11 }
  0x3b   : > { %p892_p4 = por %p891_p6, %p890_p3 }
  0x3c   : > { %p888_p13 = pneg %p887_p11 }
  0x3d   : > { %p894_p12 = por %p893_p10, %p892_p4 }
  0x3f   : > { %p895_p1 = pnand %p894_p12, %p888_p13 }
  0x41   : > { %898 = shalt.err (!%p895_p1)
}
  0x42   : > { %s899_s5 = scalar_lea.vmem %s233_s6, 128  ;;  %s1063_s25 = smov [#allocation5]  }
  0x43   : > { %p900_p2 = scmp.ne.s32.totalorder %s233_s6, %s899_s5  ;;  %s904_s22 = sshll.u32 %s1063_s25, 4  ;;  %s905_s22 = int_to_ptr.vmem [resolvable:$false] %s904_s22 }
  0x44   : > { %s906_s26 = scalar_lea.vmem %s905_s22, 256  ;;  %p907_p8 = scmp.lt.s32.totalorder %s233_s6, %s905_s22 }
  0x45   : > { %p902_p9 = pnand %p900_p2, %p856_p5  ;;  %p908_p7 = scmp.lt.s32.totalorder %s906_s26, %s899_s5 }
  0x47   : > { %p903_p11 = pneg %p902_p9  ;;  %p909_p3 = por %p908_p7, %p907_p8 }
  0x49   : > { %p910_p6 = pnand %p909_p3, %p903_p11 }
  0x4b   : > { %913 = shalt.err (!%p910_p6)
}
  0x4c   : > { %777 = dma.hbm_to_vmem [thread:$0]  (!%p1179_p0), %s1224_s11, 128, %s233_s6, %s219_s10  }
  0x4d   : > { %p1457_p13 = scmp.ne.s32.totalorder %s1456_s24, 0 }
  0x4e   : > { %s1249_s12 = sand.u32 (!%p1457_p13), 1, %s1044_s16   ;;  %p1458_p8 = scmp.ne.s32.totalorder (!%p1457_p13), %s1450_s27, 0 }
  0x4f   : > { %241 = sbr.rel (%p1457_p13) target bundleno = 221 (0xdd), region = 28  ;;  %s1252_s14 = sshll.u32 (!%p1457_p13), %s1249_s12, 1 }
  0x50   : > { %s244_s8 = scalar_lea.sflag (!%p1457_p13), [#allocation3], %s1249_s12  ;;  %s247_s7 = scalar_lea.vmem (!%p1457_p13), [#allocation2], %s1252_s14 }
  0x56   : > { %1023 = dma.done.wait (%p1458_p8), %s244_s8, 32  }
  0x57   : > { %1025 = vsyncadd (%p1458_p8), %s244_s8, 4294967264  ;;  %s739_s13 = sshll.u32 %s1249_s12, 3  ;;  %s253_s24 = scalar_lea.sflag [#allocation6], %s1249_s12 }
  0x58   : > { %s256_s11 = scalar_lea.vmem [#allocation5], %s739_s13 }
  0x59   : > { %1027 = dma.done.wait (%p1458_p8), %s253_s24, 128  }
  0x5a   : > { %1029 = vsyncadd (%p1458_p8), %s253_s24, 4294967168  ;;  %v313_v0 = vlaneseq  ;;  %v1064_v2 = vmov 1966171168   ;;  %vm345_vm0 = vcmask 1043456   ;;  %v310_v6 = vld [vmem:[%s247_s7] sm:$0x3] }
  0x5b   : > { %v428_v3 = vunpack.c.l.s4 %v1064_v2  ;;  %v335_v7 = vld [vmem:[%s256_s11] sm:$0xff]  ;;  %vm311_vm1 = vcmp.ne.s32.totalorder %v310_v6, 255  ;;  %v1065_v9 = vmov 0   ;;  %v1066_v22 = vmov 0.0   ;;  %s295_s27 = scalar_lea.vmem [#allocation10], %s1252_s14  ;;  %s281_s6 = scalar_lea.vmem [#allocation7], %s1252_s14 }
  0x5c   : > { %v314_v1 = vshrl.u32 %v313_v0, 7  ;;  %v341_v8 = vcombine.high %v335_v7, %v335_v7  ;;  %v312_v10 = vsel %vm311_vm1, 1, %v1065_v9  ;;  %v346_v11 = vsel %vm345_vm0, %v335_v7, -inf  ;;  %s518_s10 = sshll.u32 %s281_s6, 4  ;;  %s1306_s9 = sshll.u32 %s1052_s18, 5  ;;  %s1309_s10 = int_to_ptr.vmem [resolvable:$true] %s518_s10 }
  0x5d   : > { %v429_v12 = vunpack.c.0.s8 %v428_v3  ;;  %v347_v15 = vrot.slane %v346_v11, 4  ;;  %vm1282_vm4 = vcmp.lt.s32.totalorder %v313_v0, 256  ;;  %s1316_s22 = scalar_lea.hbm %s1443_s2, %s1306_s9  ;;  %s492_s18 = scalar_lea.sflag [#allocation4], %s1249_s12 }
  0x5e   : > { %v315_v4 = vsub.s32 0, %v314_v1  ;;  %v319_v5 = vsub.s32 1, %v314_v1  ;;  %v353_v16 = vsel %vm345_vm0, %v341_v8, -inf  ;;  %s914_s26 = scalar_lea.vmem %s1309_s10, 32  ;;  %p1463_p5 = scmp.ne.s32.totalorder %s1451_s28, 0 }
  0x5f   : > { %v354_v17 = vrot.slane %v353_v16, 4  ;;  %v348_v19 = vmax.f32 %v346_v11, %v347_v15  ;;  %v1275_v21 = vsub.s32 %v429_v12, %v314_v1  ;;  %p915_p0 = scmp.ne.s32.totalorder %s1309_s10, %s914_s26  ;;  %s1067_s8 = smov [#allocation7]  }
  0x60   : > { %v316_v13 = vrot.slane %v312_v10, %v315_v4  ;;  %v1267_v14 = vrot.slane %v312_v10, %v319_v5  ;;  %v328_v36 = vrot.slane %v310_v6, %v315_v4  ;;  %v332_v38 = vrot.slane %v310_v6, %v319_v5  ;;  %s918_s7 = sshll.u32 %s1067_s8, 4  ;;  %s919_s7 = int_to_ptr.vmem [resolvable:$false] %s918_s7 }
  0x61   : > { %v355_v20 = vmax.f32 %v353_v16, %v354_v17  ;;  %v349_v24 = vrot.slane %v348_v19, 2  ;;  %p916_p7 = pnand %p915_p0, %p1463_p5  ;;  %s920_s13 = scalar_lea.vmem %s919_s7, 64 }
  0x62   : > { %vm1270_vm2 = vcmp.ne.s32.totalorder %v316_v13, 0  ;;  %vm322_vm3 = vcmp.ne.s32.totalorder %v1267_v14, 0  ;;  %p921_p10 = scmp.lt.s32.totalorder %s1309_s10, %s919_s7  ;;  %p922_p12 = scmp.lt.s32.totalorder %s920_s13, %s914_s26 }
  0x63   : > { %v743_v23 = vsel %vm1270_vm2, 1.0, %v1066_v22  ;;  %v744_v25 = vsel %vm322_vm3, 1.0, %v1066_v22  ;;  %v356_v26 = vrot.slane %v355_v20, 2  ;;  %v350_v28 = vmax.f32 %v348_v19, %v349_v24  ;;  %p917_p4 = pneg %p916_p7 }
  0x64   : > { %v474_v27 = vcombine.low %v743_v23, %v744_v25  ;;  %v333_v42 = vsel %vm1270_vm2, %v328_v36, 0  ;;  %v334_v44 = vsel %vm322_vm3, %v332_v38, 0  ;;  %p923_p1 = por %p922_p12, %p921_p10 }
  0x65   : > { %v357_v29 = vmax.f32 %v355_v20, %v356_v26  ;;  %v351_v31 = vrot.slane %v350_v28, 1  ;;  %v391_v45 = vrot.slane %v333_v42, %v315_v4  ;;  %v395_v46 = vrot.slane %v334_v44, %v315_v4 }
  0x66   : > { %v481_v30 = vrot.slane %v474_v27, %v1275_v21  ;;  %p924_p2 = pnand %p923_p1, %p917_p4 }
  0x67   : > { %v358_v33 = vrot.slane %v357_v29, 1  ;;  %v352_v35 = vmax.f32 %v350_v28, %v351_v31  ;;  %vm396_vm5 = vcmp.eq.s32.totalorder %v314_v1, %v391_v45  ;;  %vm397_vm6 = vcmp.eq.s32.totalorder %v314_v1, %v395_v46 }
  0x68   : > { %v488_v34 = vrot.slane %v481_v30, %v1275_v21  ;;  %v398_v47 = vsel %vm396_vm5, %v335_v7, 0.0  ;;  %v399_v49 = vsel %vm397_vm6, %v341_v8, 0.0 }
  0x69   : > { %v359_v37 = vmax.f32 %v357_v29, %v358_v33  ;;  %v360_v39 = vsub.f32 %v335_v7, %v352_v35  ;;  %v400_v54 = vsel %vm345_vm0, %v398_v47, 0.0  ;;  %v407_v56 = vsel %vm345_vm0, %v399_v49, 0.0 }
  0x6a   : > { %490 = vst.msk [vmem:[%s295_s27] sm:$0x3] %vm1282_vm4, %v488_v34  ;;  %v401_v59 = vrot.slane %v400_v54, 4  ;;  %v408_v61 = vrot.slane %v407_v56, 4 }
  0x6b   : > { %v361_v40 = vsub.f32 %v341_v8, %v359_v37  ;;  %v362_v41 = vmul.f32 1.442695, %v360_v39 }
  0x6c   : > { %v402_v1 = vadd.f32 %v401_v59, %v400_v54  ;;  %v409_v3 = vadd.f32 %v408_v61, %v407_v56 }
  0x6d   : > { %v364_v43 = vmul.f32 1.442695, %v361_v40  ;;  %842 = vpow2.f32 %v362_v41 }
  0x6e   : > { %v403_v7 = vrot.slane %v402_v1, 2  ;;  %v410_v8 = vrot.slane %v409_v3, 2 }
  0x6f   : > { %844 = vpow2.f32 %v364_v43 }
  0x70   : > { %v404_v9 = vadd.f32 %v403_v7, %v402_v1  ;;  %v411_v10 = vadd.f32 %v410_v8, %v409_v3 }
  0x72   : > { %v405_v11 = vrot.slane %v404_v9, 1  ;;  %v412_v12 = vrot.slane %v411_v10, 1 }
  0x74   : > { %v406_v17 = vadd.f32 %v405_v11, %v404_v9  ;;  %v413_v20 = vadd.f32 %v412_v12, %v411_v10 }
  0x77   : > { %v843_v48 = vpop.eup %842 }
  0x78   : > { %v366_v51 = vsel %vm345_vm0, %v843_v48, 0.0 }
  0x79   : > { %v845_v50 = vpop.eup %844  ;;  %v367_v52 = vrot.slane %v366_v51, 4 }
  0x7a   : > { %v373_v53 = vsel %vm345_vm0, %v845_v50, 0.0 }
  0x7b   : > { %v374_v55 = vrot.slane %v373_v53, 4  ;;  %v368_v57 = vadd.f32 %v367_v52, %v366_v51 }
  0x7d   : > { %v375_v58 = vadd.f32 %v374_v55, %v373_v53  ;;  %v369_v60 = vrot.slane %v368_v57, 2 }
  0x7f   : > { %v376_v62 = vrot.slane %v375_v58, 2  ;;  %v370_v63 = vadd.f32 %v369_v60, %v368_v57 }
  0x81   : > { %v377_v0 = vadd.f32 %v376_v62, %v375_v58  ;;  %v371_v2 = vrot.slane %v370_v63, 1 }
  0x83   : > { %v378_v4 = vrot.slane %v377_v0, 1  ;;  %v372_v5 = vadd.f32 %v371_v2, %v370_v63 }
  0x85   : > { %v379_v6 = vadd.f32 %v378_v4, %v377_v0  ;;  %846 = vlog2.f32 %v372_v5 }
  0x87   : > { %848 = vlog2.f32 %v379_v6 }
  0x8f   : > { %v847_v13 = vpop.eup %846 }
  0x90   : > { %v381_v16 = vmul.f32 0.6931472, %v847_v13 }
  0x91   : > { %v849_v15 = vpop.eup %848 }
  0x92   : > { %v383_v19 = vmul.f32 0.6931472, %v849_v15  ;;  %v384_v22 = vadd.f32 %v381_v16, %v352_v35 }
  0x94   : > { %v385_v23 = vadd.f32 %v383_v19, %v359_v37  ;;  %v416_v24 = vsub.f32 %v406_v17, %v384_v22  ;;  %v414_v25 = vsub.f32 %v384_v22, %v406_v17 }
  0x96   : > { %v417_v26 = vsub.f32 %v413_v20, %v385_v23  ;;  %v415_v27 = vsub.f32 %v385_v23, %v413_v20  ;;  %v418_v28 = vmul.f32 1.442695, %v416_v24  ;;  %v422_v29 = vsel %vm1270_vm2, %v414_v25, 0.0 }
  0x98   : > { %v420_v30 = vmul.f32 1.442695, %v417_v26  ;;  %v423_v31 = vsel %vm322_vm3, %v415_v27, 0.0  ;;  %850 = vpow2.f32 %v418_v28 }
  0x99   : > { %v426_v33 = vcombine.low %v422_v29, %v423_v31 }
  0x9a   : > { %852 = vpow2.f32 %v420_v30 }
  0x9b   : > { %v433_v34 = vrot.slane %v426_v33, %v1275_v21 }
  0x9d   : > { %v440_v35 = vrot.slane %v433_v34, %v1275_v21 }
  0x9f   : > { %446 = vst.msk [vmem:[%s281_s6] sm:$0x3] %vm1282_vm4, %v440_v35 }
  0xa0   : > { %927 = shalt.err (!%p924_p2)
}
  0xa1   : > { %s928_s12 = scalar_lea.hbm %s1316_s22, 32  ;;  %s932_s6 = scalar_lea.hbm %s1443_s2, 64 }
  0xa2   : > { %p929_p9 = scmp.ne.s32.totalorder %s1316_s22, %s928_s12  ;;  %p933_p6 = scmp.lt.u32.totalorder %s1316_s22, %s1443_s2 }
  0xa3   : > { %p934_p13 = scmp.lt.u32.totalorder %s932_s6, %s928_s12  ;;  %p936_p0 = scmp.lt.u32.totalorder %s928_s12, %s1316_s22 }
  0xa4   : > { %p930_p11 = pnand %p929_p9, %p1463_p5 }
  0xa5   : > { %p935_p8 = por %p934_p13, %p933_p6 }
  0xa6   : > { %p931_p3 = pneg %p930_p11 }
  0xa7   : > { %p937_p7 = por %p936_p0, %p935_p8 }
  0xa9   : > { %p938_p4 = pnand %p937_p7, %p931_p3 }
  0xab   : > { %941 = shalt.err (!%p938_p4)
}
  0xac   : > { %765 = dma.vmem_to_hbm [thread:$0]  (%p1463_p5), %s1309_s10, 32, %s1316_s22, %s492_s18   ;;  %v851_v36 = vpop.eup %850 }
  0xad   : > { %v853_v37 = vpop.eup %852  ;;  %v447_v38 = vsel %vm1270_vm2, %v851_v36, 1.0  ;;  %s288_s26 = scalar_lea.vmem [#allocation8], %s1252_s14  ;;  %s496_s7 = sand.u32 1, %s1126_s21  }
  0xae   : > { %v448_v39 = vsel %vm322_vm3, %v853_v37, 1.0  ;;  %s534_s8 = sshll.u32 %s288_s26, 4  ;;  %s550_s13 = sshll.u32 %s295_s27, 4  ;;  %s1351_s8 = int_to_ptr.vmem [resolvable:$true] %s534_s8  ;;  %s1360_s13 = int_to_ptr.vmem [resolvable:$true] %s550_s13 }
  0xaf   : > { %v451_v40 = vcombine.low %v447_v38, %v448_v39  ;;  %s1358_s18 = scalar_lea.hbm %s1444_s3, %s1306_s9  ;;  %s1366_s24 = scalar_lea.hbm %s1445_s4, %s1306_s9 }
  0xb0   : > { %s1370_s14 = scalar_lea.sflag [#allocation9], %s496_s7  ;;  %s942_s27 = scalar_lea.vmem %s1351_s8, 32 }
  0xb1   : > { %v458_v41 = vrot.slane %v451_v40, %v1275_v21  ;;  %p943_p10 = scmp.ne.s32.totalorder %s1351_s8, %s942_s27  ;;  %s1068_s11 = smov [#allocation8]  }
  0xb2   : > { %s946_s6 = sshll.u32 %s1068_s11, 4  ;;  %s947_s6 = int_to_ptr.vmem [resolvable:$false] %s946_s6 }
  0xb3   : > { %v465_v18 = vrot.slane %v458_v41, %v1275_v21  ;;  %p944_p12 = pnand %p943_p10, %p1463_p5  ;;  %s948_s5 = scalar_lea.vmem %s947_s6, 64 }
  0xb4   : > { %p949_p2 = scmp.lt.s32.totalorder %s1351_s8, %s947_s6  ;;  %p950_p9 = scmp.lt.s32.totalorder %s948_s5, %s942_s27 }
  0xb5   : > { %467 = vst.msk [vmem:[%s288_s26] sm:$0x3] %vm1282_vm4, %v465_v18  ;;  %p945_p1 = pneg %p944_p12 }
  0xb6   : > { %p951_p11 = por %p950_p9, %p949_p2 }
  0xb8   : > { %p952_p3 = pnand %p951_p11, %p945_p1 }
  0xba   : > { %955 = shalt.err (!%p952_p3)
}
  0xbb   : > { %s956_s9 = scalar_lea.hbm %s1358_s18, 32  ;;  %s960_s7 = scalar_lea.hbm %s1444_s3, 64 }
  0xbc   : > { %p957_p6 = scmp.ne.s32.totalorder %s1358_s18, %s956_s9  ;;  %p961_p0 = scmp.lt.u32.totalorder %s1358_s18, %s1444_s3 }
  0xbd   : > { %p962_p7 = scmp.lt.u32.totalorder %s960_s7, %s956_s9  ;;  %p964_p10 = scmp.lt.u32.totalorder %s956_s9, %s1358_s18 }
  0xbe   : > { %p958_p13 = pnand %p957_p6, %p1463_p5 }
  0xbf   : > { %p963_p4 = por %p962_p7, %p961_p0 }
  0xc0   : > { %p959_p8 = pneg %p958_p13 }
  0xc1   : > { %p965_p12 = por %p964_p10, %p963_p4 }
  0xc3   : > { %p966_p1 = pnand %p965_p12, %p959_p8 }
  0xc5   : > { %969 = shalt.err (!%p966_p1)
}
  0xc6   : > { %766 = dma.vmem_to_hbm [thread:$0]  (%p1463_p5), %s1351_s8, 32, %s1358_s18, %s1370_s14  }
  0xc7   : > { %s970_s12 = scalar_lea.vmem %s1360_s13, 32  ;;  %s1069_s21 = smov [#allocation10]  }
  0xc8   : > { %p971_p2 = scmp.ne.s32.totalorder %s1360_s13, %s970_s12  ;;  %s974_s27 = sshll.u32 %s1069_s21, 4  ;;  %s975_s27 = int_to_ptr.vmem [resolvable:$false] %s974_s27 }
  0xc9   : > { %s976_s11 = scalar_lea.vmem %s975_s27, 64  ;;  %p977_p3 = scmp.lt.s32.totalorder %s1360_s13, %s975_s27 }
  0xca   : > { %p972_p9 = pnand %p971_p2, %p1463_p5  ;;  %p978_p6 = scmp.lt.s32.totalorder %s976_s11, %s970_s12 }
  0xcc   : > { %p973_p11 = pneg %p972_p9  ;;  %p979_p13 = por %p978_p6, %p977_p3 }
  0xce   : > { %p980_p8 = pnand %p979_p13, %p973_p11 }
  0xd0   : > { %983 = shalt.err (!%p980_p8)
}
  0xd1   : > { %s984_s8 = scalar_lea.hbm %s1366_s24, 32  ;;  %s988_s5 = scalar_lea.hbm %s1445_s4, 64 }
  0xd2   : > { %p985_p0 = scmp.ne.s32.totalorder %s1366_s24, %s984_s8  ;;  %p989_p10 = scmp.lt.u32.totalorder %s1366_s24, %s1445_s4 }
  0xd3   : > { %p990_p12 = scmp.lt.u32.totalorder %s988_s5, %s984_s8  ;;  %p992_p2 = scmp.lt.u32.totalorder %s984_s8, %s1366_s24 }
  0xd4   : > { %p986_p7 = pnand %p985_p0, %p1463_p5 }
  0xd5   : > { %p991_p1 = por %p990_p12, %p989_p10 }
  0xd6   : > { %p987_p4 = pneg %p986_p7 }
  0xd7   : > { %p993_p9 = por %p992_p2, %p991_p1 }
  0xd9   : > { %p994_p11 = pnand %p993_p9, %p987_p4 }
  0xdb   : > { %997 = shalt.err (!%p994_p11)
}
  0xdc   : > { %767 = dma.vmem_to_hbm [thread:$0]  (%p1463_p5), %s1360_s13, 32, %s1366_s24, %s1370_s14  }
  0xdd PF: > { %s562_s26 = sand.u32 1, %s1040_s15   ;;  %p1464_p3 = scmp.ne.s32.totalorder %s1452_s30, 0 }
  0xde   : > { %p1465_p6 = scmp.ge.s32.totalorder %s1060_s20, 2  ;;  %s563_s7 = scalar_lea.sflag [#allocation4], %s562_s26 }
  0xe0   : > { %p779_p13 = pnand %p1465_p6, %p1464_p3 }
  0xe2   : > { %1031 = dma.done.wait (!%p779_p13), %s563_s7, 32  }
  0xe3   : > { %1033 = vsyncadd (!%p779_p13), %s563_s7, 4294967264  ;;  %s1466_s10 = sadd.s32 4294967294, %s1060_s20  }
  0xe4   : > { %s571_s22 = sand.u32 1, %s1466_s10  }
  0xe5   : > { %s572_s12 = scalar_lea.sflag [#allocation9], %s571_s22 }
  0xe6   : > { %1035 = dma.done.wait (!%p779_p13), %s572_s12, 64  }
  0xe7   : > { %1037 = vsyncadd (!%p779_p13), %s572_s12, 4294967232  ;;  %s27_s20 = sadd.s32 1, %s1060_s20   ;;  %s1467_s15 = smov %s1044_s16 }
  0xe8   : > { %p24_p5 = scmp.ge.s32.totalorder %s27_s20, 4   ;;  %s1468_s16 = smov %s1048_s17 }
  0xe9   : > { %s1469_s17 = smov %s1157_s29  ;;  %s1470_s18 = smov %s1056_s19 }
  0xea   : > { %s1471_s19 = smov %s1473_s23  ;;  %26 = sbr.rel (!%p24_p5) target bundleno = 10 (0xa), region = 118 }
  0xf1   :  { %586 = vsyncpa [#allocation3], 1 }
  0xf2   :  { %588 = vsyncpa [#allocation3 + $0x1], 1 }
  0xf3   :  { %589 = vsyncpa [#allocation6], 1 }
  0xf4   :  { %591 = vsyncpa [#allocation6 + $0x1], 1 }
  0xf5   :  { %592 = vsyncpa [#allocation4], 1 }
  0xf6   :  { %594 = vsyncpa [#allocation4 + $0x1], 1 }
  0xf7   :  { %595 = vsyncpa [#allocation9], 1 }
  0xf8   :  { %597 = vsyncpa [#allocation9 + $0x1], 1 }

</bundles_post_ra>
